<compile_context>
chip_gen: v7x
topology: tpu7x:2x2x1
jax: 0.10.0
libtpu: 0.0.40
codegen_flags: <defaults>
</compile_context>

<pallas_src>
import numpy as np

import jax
import jax.numpy as jnp
from jax import lax
from jax.experimental import pallas as pl
from jax.experimental.pallas import tpu as pltpu

ALPHA = 0.5
MAX_TILE_N = 131072            # lanes per grid step (multiple of 128)
SINGLE_BLOCK_MAX_N = 4096      # below this, take the whole batch in one block
VMEM_TILE_BUDGET = 24 * 1024 * 1024   # headroom under the 32 MiB scoped limit


def _round_up(v, m):
    return ((v + m - 1) // m) * m


def _lyapunov_kernel(xt_ref, w_ref, alpha_ref, out_ref):
    """xt_ref   : (D, TILE_N)  transposed input block (batch on lanes).
       w_ref    : (D, O)       folded weight W1 @ W2 (biases cancel exactly).
       alpha_ref: (D, 1)       ALPHA on rows 0,1; zero elsewhere.
       out_ref  : (O, TILE_N)  lane-dense output block."""
    xt = xt_ref[...].astype(jnp.float32)        # (D, T); upcast if bf16 DMA
    w = w_ref[...]                              # (D, O)
    alpha_col = alpha_ref[...]                  # (D, 1)
    o = out_ref.shape[0]

    alpha_contrib = jnp.abs(xt) * alpha_col     # (D, T); rows >= 2 are zero

    if o == 1:
        # Pure VPU path: mul + abs + mul + add per data vreg, one sublane reduce.
        out_ref[...] = jnp.sum(xt * w + alpha_contrib, axis=0, keepdims=True)
    elif o <= 8:
        alpha_row = jnp.sum(alpha_contrib, axis=0, keepdims=True)   # (1, T)
        for j in range(o):  # unrolled on the VPU; contraction dim is only D
            out_ref[j:j + 1, :] = (
                jnp.sum(xt * w[:, j:j + 1], axis=0, keepdims=True) + alpha_row)
    else:
        # Large O: small contraction over D on the MXU, plus the alpha row.
        alpha_row = jnp.sum(alpha_contrib, axis=0, keepdims=True)
        y = lax.dot_general(w, xt, (((0,), (0,)), ((), ())),
                            preferred_element_type=jnp.float32)     # (O, T)
        out_ref[...] = y + alpha_row


def lyapunov_forward(x, w1_t, b1, w2_t, b2, *, tile_n=None,
                     x_is_transposed=False, input_dtype=jnp.float32):
    """x: (N, D) [or (D, N) if x_is_transposed]; w1_t: (D, H); b1: (H,);
       w2_t: (H, O); b2: (O,). Returns (N, O), matching the PyTorch module."""
    if x_is_transposed:
        d, n = x.shape
    else:
        n, d = x.shape
    o = w2_t.shape[1]
    assert d >= 2, "forward() reads x[:, 0] and x[:, 1]"
    del b1, b2  # biases cancel exactly in y - y0 (no activation in forward)

    # Fold the two linear layers into one tiny (D, O) constant; precompute the
    # alpha mask so the kernel does no iota/compare/select.
    w_eff = w1_t.astype(jnp.float32) @ w2_t.astype(jnp.float32)
    alpha_col = (ALPHA * (jnp.arange(d) < 2)).astype(jnp.float32).reshape(d, 1)

    # Lane-dense layout: batch on lanes. The transpose is a full extra HBM
    # pass; producers that can supply x as (D, N) should set x_is_transposed.
    x_t = x if x_is_transposed else x.T
    x_t = x_t.astype(input_dtype)
    itemsize = np.dtype(input_dtype).itemsize

    if tile_n is None:
        if n <= SINGLE_BLOCK_MAX_N:
            tile_n = n                       # one block (full-extent last dim)
        else:
            # VMEM-aware cap: bytes per lane column, double-buffered in + out.
            bytes_per_col = 2 * (_round_up(d, 8) * itemsize + _round_up(o, 8) * 4)
            vmem_cap = max(128, (VMEM_TILE_BUDGET // bytes_per_col) // 128 * 128)
            # >= 2 grid steps so v7x's two TensorCores both get a shard.
            tile_n = min(MAX_TILE_N, vmem_cap, _round_up(pl.cdiv(n, 2), 128))
    grid = (pl.cdiv(n, tile_n),)

    out_t = pl.pallas_call(
        _lyapunov_kernel,
        out_shape=jax.ShapeDtypeStruct((o, n), jnp.float32),
        grid=grid,
        in_specs=[
            pl.BlockSpec((d, tile_n), lambda i: (0, i)),   # x^T streamed over batch
            pl.BlockSpec((d, o), lambda i: (0, 0)),        # folded weight (resident)
            pl.BlockSpec((d, 1), lambda i: (0, 0)),        # alpha mask (resident)
        ],
        out_specs=pl.BlockSpec((o, tile_n), lambda i: (0, i)),
        compiler_params=pltpu.CompilerParams(
            dimension_semantics=("parallel",),
            vmem_limit_bytes=32 * 1024 * 1024,             # safe on v5e/v6e/v7x
        ),
        cost_estimate=pl.CostEstimate(
            flops=2 * n * d * o + 3 * n * d,
            transcendentals=0,
            bytes_accessed=n * d * itemsize + 4 * (d * o + d + n * o),
        ),
    )(x_t, w_eff, alpha_col)

    if o == 1:
        return out_t.reshape(n, 1)   # no second transpose pass for the common case
    return out_t.T


def reference_forward(x, w1_t, b1, w2_t, b2):
    y = (x @ w1_t + b1) @ w2_t + b2
    y0 = (jnp.zeros_like(x) @ w1_t + b1) @ w2_t + b2
    alpha_eps = (jnp.abs(x[:, 0:1]) + jnp.abs(x[:, 1:2])) * ALPHA
    return y - y0 + alpha_eps


if __name__ == "__main__":
    # Small shapes consistent with the module: batch=8, input_dim=4,
    # hidden=32, output_dim=1 (Lyapunov value).
    N, D, H, O = 8, 4, 32, 1

    key = jax.random.PRNGKey(0)
    kx, kw1, kb1, kw2, kb2 = jax.random.split(key, 5)

    x = jax.random.normal(kx, (N, D), dtype=jnp.float32)

    # Deterministic init mimicking nn.Linear's U(-1/sqrt(fan_in), 1/sqrt(fan_in)).
    lim1 = 1.0 / jnp.sqrt(jnp.float32(D))
    lim2 = 1.0 / jnp.sqrt(jnp.float32(H))
    w1_t = jax.random.uniform(kw1, (D, H), jnp.float32, -lim1, lim1)  # (in, out)
    b1 = jax.random.uniform(kb1, (H,), jnp.float32, -lim1, lim1)
    w2_t = jax.random.uniform(kw2, (H, O), jnp.float32, -lim2, lim2)
    b2 = jax.random.uniform(kb2, (O,), jnp.float32, -lim2, lim2)

    fwd = jax.jit(lambda x_, a, b, c, d_: lyapunov_forward(x_, a, b, c, d_))
    out = fwd(x, w1_t, b1, w2_t, b2)
    out = jax.block_until_ready(out)

    ref = reference_forward(x, w1_t, b1, w2_t, b2)
    assert out.shape == (N, O)
    assert jnp.allclose(out, ref, atol=1e-5, rtol=1e-5), "mismatch vs reference"

    print("KERNEL_OK")
</pallas_src>

<mosaic_0001>
module attributes {stable_mosaic.version = 11 : i64} {
  func.func @_lyapunov_kernel(%arg0: i32, %arg1: memref<4x8xf32, #tpu.memory_space<vmem>>, %arg2: memref<4x1xf32, #tpu.memory_space<vmem>>, %arg3: memref<4x1xf32, #tpu.memory_space<vmem>>, %arg4: memref<1x8xf32, #tpu.memory_space<vmem>>) attributes {dimension_semantics = [#tpu.dimension_semantics<parallel>], iteration_bounds = array<i64: 1>, scalar_prefetch = 0 : i64, scratch_operands = 0 : i64, tpu.core_type = #tpu.core_type<tc>, window_params = [{transform_indices = @transform_0, window_bounds = array<i64: 4, 8>}, {pipeline_mode = #tpu.pipeline_mode<synchronous>, transform_indices = @transform_1, window_bounds = array<i64: 4, 1>}, {pipeline_mode = #tpu.pipeline_mode<synchronous>, transform_indices = @transform_2, window_bounds = array<i64: 4, 1>}, {transform_indices = @transform_3, window_bounds = array<i64: 1, 8>}]} {
    %c0 = arith.constant 0 : index
    %c0_0 = arith.constant 0 : index
    %0 = vector.load %arg1[%c0, %c0_0] : memref<4x8xf32, #tpu.memory_space<vmem>>, vector<4x8xf32>
    %c0_1 = arith.constant 0 : index
    %c0_2 = arith.constant 0 : index
    %1 = vector.load %arg2[%c0_1, %c0_2] : memref<4x1xf32, #tpu.memory_space<vmem>>, vector<4x1xf32>
    %c0_3 = arith.constant 0 : index
    %c0_4 = arith.constant 0 : index
    %2 = vector.load %arg3[%c0_3, %c0_4] : memref<4x1xf32, #tpu.memory_space<vmem>>, vector<4x1xf32>
    %3 = math.absf %0 : vector<4x8xf32>
    %4 = vector.broadcast %2 : vector<4x1xf32> to vector<4x8xf32>
    %5 = arith.mulf %3, %4 : vector<4x8xf32>
    %6 = vector.broadcast %1 : vector<4x1xf32> to vector<4x8xf32>
    %7 = arith.mulf %0, %6 : vector<4x8xf32>
    %8 = arith.addf %7, %5 : vector<4x8xf32>
    %cst = arith.constant dense<0.000000e+00> : vector<8xf32>
    %9 = vector.multi_reduction <add>, %8, %cst [0] : vector<4x8xf32> to vector<8xf32>
    %10 = vector.shape_cast %9 : vector<8xf32> to vector<1x8xf32>
    %c0_5 = arith.constant 0 : index
    %c0_6 = arith.constant 0 : index
    %11 = vector.load %arg4[%c0_5, %c0_6] : memref<1x8xf32, #tpu.memory_space<vmem>>, vector<1x8xf32>
    tpu.vector_store %arg4[%c0_5, %c0_6], %10 {strides = array<i32>} : memref<1x8xf32, #tpu.memory_space<vmem>>, vector<1x8xf32>,
    return
  }
  func.func @transform_0(%arg0: i32) -> (i32, i32) {
    %c0_i32 = arith.constant 0 : i32
    %c0_i32_0 = arith.constant 0 : i32
    return %c0_i32, %arg0 : i32, i32
  }
  func.func @transform_1(%arg0: i32) -> (i32, i32) {
    %c0_i32 = arith.constant 0 : i32
    %c0_i32_0 = arith.constant 0 : i32
    %c0_i32_1 = arith.constant 0 : i32
    return %c0_i32, %c0_i32_0 : i32, i32
  }
  func.func @transform_2(%arg0: i32) -> (i32, i32) {
    %c0_i32 = arith.constant 0 : i32
    %c0_i32_0 = arith.constant 0 : i32
    %c0_i32_1 = arith.constant 0 : i32
    return %c0_i32, %c0_i32_0 : i32, i32
  }
  func.func @transform_3(%arg0: i32) -> (i32, i32) {
    %c0_i32 = arith.constant 0 : i32
    %c0_i32_0 = arith.constant 0 : i32
    return %c0_i32, %arg0 : i32, i32
  }
}

</mosaic_0001>

<bundles_post_ra>
// kernel: _lambda_.1
= control target key start
LH: loop header
LB: loop body
LE: loop exit
PB: predicated region body
PF: predicated region fallthrough
CT: control target
= control target key end

     0   :  { %v83_v1 = vmov 0   ;;  %s126_s0 = inlined_call_operand.vmem [shape: f32[4,8], index: 0, kind: input, shape index: {}]   ;;  %s127_s1 = inlined_call_operand.vmem [shape: f32[4,1], index: 1, kind: input, shape index: {}]   ;;  %s128_s2 = inlined_call_operand.vmem [shape: f32[4,1], index: 2, kind: input, shape index: {}]   ;;  %s129_s3 = inlined_call_operand.hbm [shape: f32[1,8], index: 3, kind: output, shape index: {}]  }
   0x1   :  { %v17_v0 = vld [vmem:[%s128_s2] sm:$0xf]  ;;  %58 = vset.pattern.permute.xlu0 %v83_v1 }
   0x2   :  { %8 = vsyncpa [#allocation3], 0  ;;  %21 = vperm.xlu0 %58, %v17_v0   ;;  %v16_v2 = vld [vmem:[%s127_s1] sm:$0xf]  ;;  %vm32_vm0 = vcmask 60416   ;;  %s84_s2 = smov [#allocation2]  }
   0x3   :  { %v15_v3 = vld [vmem:[%s126_s0] sm:$0xf]  ;;  %s48_s18 = sshll.u32 %s84_s2, 4  ;;  %vm40_vm1 = vcmask 57344   ;;  %s49_s18 = int_to_ptr.vmem [resolvable:$true] %s48_s18 }
   0x4   :  { %v18_v5 = vand.u32 2147483647, %v15_v3  ;;  %s59_s0 = scalar_lea.vmem %s49_s18, 16  ;;  %s63_s1 = scalar_lea.vmem %s49_s18, 32 }
   0x5   :  { %p60_p0 = scmp.ne.s32.totalorder %s49_s18, %s59_s0  ;;  %p64_p1 = scmp.lt.s32.totalorder %s49_s18, %s49_s18 }
   0x6   :  { %27 = vperm.xlu0 %58, %v16_v2   ;;  %p65_p2 = scmp.lt.s32.totalorder %s63_s1, %s59_s0 }
   0x8   :  { %p66_p3 = por %p65_p2, %p64_p1 }
   0xa   :  { %p67_p4 = pnand %p66_p3, %p60_p0 }
  0x81   :  { %v22_v4 = vpop.permute.xlu0 %21 }
  0x82   :  { %v24_v7 = vmul.f32 %v22_v4, %v18_v5 }
  0x85   :  { %v28_v6 = vpop.permute.xlu0 %27 }
  0x86   :  { %v30_v8 = vmul.f32 %v28_v6, %v15_v3 }
  0x88   :  { %v31_v9 = vadd.f32 %v30_v8, %v24_v7 }
  0x8a   :  { %v33_v10 = vsel %vm32_vm0, %v31_v9, 0.0 }
  0x8b   :  { %v34_v11 = vrot.slane %v33_v10, 4 }
  0x8d   :  { %v35_v12 = vadd.f32 %v34_v11, %v33_v10 }
  0x8f   :  { %v36_v13 = vrot.slane %v35_v12, 2 }
  0x91   :  { %v37_v14 = vadd.f32 %v36_v13, %v35_v12 }
  0x93   :  { %v38_v15 = vrot.slane %v37_v14, 1 }
  0x95   :  { %v39_v16 = vadd.f32 %v38_v15, %v37_v14 }
  0x97   :  { %41 = vst.msk [vmem:[#allocation2] sm:$0x1] %vm40_vm1, %v39_v16 }
  0x98   :  { %70 = shalt.err (!%p67_p4)
}
  0x99   :  { %s71_s21 = scalar_lea.hbm %s129_s3, 16 }
  0x9a   :  { %p72_p5 = scmp.ne.s32.totalorder %s129_s3, %s71_s21  ;;  %p75_p6 = scmp.lt.u32.totalorder %s71_s21, %s129_s3 }
  0x9c   :  { %p77_p7 = pnand %p75_p6, %p72_p5 }
  0x9e   :  { %80 = shalt.err (!%p77_p7)
}
  0x9f   :  { %51 = dma.vmem_to_hbm [thread:$0]  %s49_s18, 16, %s129_s3, [#allocation3]  }
  0xa0   :  { %81 = dma.done.wait [#allocation3], 16  }
  0xa1   :  { %82 = vsyncadd [#allocation3], 4294967280 }
  0xa2   :  { %55 = vsyncpa [#allocation3], 1 }

</bundles_post_ra>
